<compile_context>
chip_gen: v6e
topology: v6e:2x2x1
jax: 0.10.0
libtpu: 0.0.40
codegen_flags: <defaults>
</compile_context>

<pallas_src>
import jax
import jax.numpy as jnp
from jax.experimental import pallas as pl
from jax.experimental.pallas import tpu as pltpu

EPS = 1e-5


def _resblock1x1_kernel(x_ref, w1_ref, g1_ref, b1_ref,
                        w2_ref, g2_ref, b2_ref, o_ref,
                        xs_ref, hs_ref):
    """All refs live fully in VMEM (no grid -> no pipelining bookkeeping).

    x_ref / o_ref : (N, C, HW)   channels on sublanes, spatial on lanes
    w*_ref        : (C, C)       (out_ch, in_ch); applied as W @ slab
    g*/b*_ref     : (C, 1)       per-channel affine, broadcast over lanes
    xs_ref        : (C, N*HW)    repacked input slab (conv1 input + residual)
    hs_ref        : (C, N*HW)    working slab, holds h1 then h2
    """
    N, C, HW = x_ref.shape
    inv_count = 1.0 / float(N * HW)

    # ---- repack x (N, C, HW) -> xs (C, N*HW): N lane-dense VMEM copies ------
    for n in range(N):
        xs_ref[:, n * HW:(n + 1) * HW] = x_ref[n]

    # ---- layer 1: conv1 (one MXU launch) + centered BN1 stats ----------------
    hs_ref[...] = jnp.dot(w1_ref[...], xs_ref[...],
                          preferred_element_type=jnp.float32)       # (C, N*HW)
    m1 = jnp.sum(hs_ref[...], axis=1, keepdims=True) * inv_count    # (C, 1)
    d1 = hs_ref[...] - m1
    v1 = jnp.sum(d1 * d1, axis=1, keepdims=True) * inv_count        # biased var
    scale1 = jax.lax.rsqrt(v1 + EPS) * g1_ref[...]                  # fold affine
    shift1 = b1_ref[...] - m1 * scale1

    # ---- layer 2: bn1 + relu + conv2 (one MXU launch) + centered BN2 stats ---
    a = jnp.maximum(hs_ref[...] * scale1 + shift1, 0.0)             # relu(bn1(.))
    hs_ref[...] = jnp.dot(w2_ref[...], a,
                          preferred_element_type=jnp.float32)       # (C, N*HW)
    m2 = jnp.sum(hs_ref[...], axis=1, keepdims=True) * inv_count
    d2 = hs_ref[...] - m2
    v2 = jnp.sum(d2 * d2, axis=1, keepdims=True) * inv_count
    scale2 = jax.lax.rsqrt(v2 + EPS) * g2_ref[...]
    shift2 = b2_ref[...] - m2 * scale2

    # ---- bn2 + residual + relu, then unpack to (N, C, HW) lane-dense stores --
    out = jnp.maximum(xs_ref[...] + hs_ref[...] * scale2 + shift2, 0.0)
    for n in range(N):
        o_ref[n] = out[:, n * HW:(n + 1) * HW]


def resblock1x1_pallas(x_nchw, w1, g1, b1, w2, g2, b2):
    """x_nchw: (N, C, H, W) f32.  w*: (Cout, Cin) (PyTorch conv weight squeezed).
    Returns (N, C, H, W) f32."""
    N, C, H, W = x_nchw.shape
    HW = H * W
    NHW = N * HW

    # Free, contiguous reshapes only -- no XLA transposes, no extra HBM traffic.
    x3 = x_nchw.reshape(N, C, HW)
    g1r, b1r = g1.reshape(C, 1), b1.reshape(C, 1)
    g2r, b2r = g2.reshape(C, 1), b2.reshape(C, 1)

    # ---- VMEM budget (no-grid path keeps everything resident) ---------------
    # x block + out block + 2 slab scratches + weights/params + headroom.
    vmem_bytes = 4 * (4 * N * C * HW + 2 * C * C + 8 * C) + (2 << 20)
    if vmem_bytes > (48 << 20):   # v7x-safe ceiling (64 MiB physical VMEM)
        # TODO(synk): dispatch to a gridded two-phase-BN path instead of raising.
        raise NotImplementedError("ResBlock1x1 too large for single-VMEM kernel")
    compiler_params = None
    if vmem_bytes > (32 << 20):   # above default scoped limit: raise it explicitly
        compiler_params = pltpu.CompilerParams(vmem_limit_bytes=vmem_bytes)

    vmem = pl.BlockSpec(memory_space=pltpu.MemorySpace.VMEM)

    flops = 4 * NHW * C * C + 16 * NHW * C          # 2 matmuls + BN/relu/add
    bytes_accessed = 4 * (2 * N * C * HW + 2 * C * C + 4 * C)

    out3 = pl.pallas_call(
        _resblock1x1_kernel,
        out_shape=jax.ShapeDtypeStruct((N, C, HW), jnp.float32),
        in_specs=[vmem] * 7,
        out_specs=vmem,
        scratch_shapes=[pltpu.VMEM((C, NHW), jnp.float32),   # xs slab
                        pltpu.VMEM((C, NHW), jnp.float32)],  # h1/h2 slab
        compiler_params=compiler_params,
        cost_estimate=pl.CostEstimate(
            flops=flops, transcendentals=2 * C, bytes_accessed=bytes_accessed),
    )(x3, w1, g1r, b1r, w2, g2r, b2r)

    return out3.reshape(N, C, H, W)


def resblock1x1_reference(x_nchw, w1, g1, b1, w2, g2, b2):
    """Pure-JAX reference with PyTorch training-mode semantics (verification)."""
    N, C, H, W = x_nchw.shape
    x2d = jnp.transpose(x_nchw, (0, 2, 3, 1)).reshape(N * H * W, C)

    def bn(h, g, b):
        m = jnp.mean(h, axis=0, keepdims=True)
        v = jnp.mean((h - m) ** 2, axis=0, keepdims=True)
        return (h - m) / jnp.sqrt(v + EPS) * g + b

    h = jnp.maximum(bn(x2d @ w1.T, g1, b1), 0.0)
    h2 = bn(h @ w2.T, g2, b2)
    out = jnp.maximum(x2d + h2, 0.0)
    return jnp.transpose(out.reshape(N, H, W, C), (0, 3, 1, 2))


if __name__ == "__main__":
    # Small shapes consistent with the module: NCHW input, in_channel == out_channel.
    N, C, H, W = 2, 32, 16, 16   # H*W = 256 -> lane-dense (multiple of 128)

    key = jax.random.PRNGKey(0)
    kx, k1, k2, kg1, kb1, kg2, kb2 = jax.random.split(key, 7)

    x = jax.random.normal(kx, (N, C, H, W), dtype=jnp.float32)

    # conv1x1 weights: PyTorch shape (out, in, 1, 1) -> stored as (out, in)
    w1 = jax.random.normal(k1, (C, C), dtype=jnp.float32) * 0.1
    w2 = jax.random.normal(k2, (C, C), dtype=jnp.float32) * 0.1

    # BatchNorm affine params (non-trivial so BN matters).
    gamma1 = 1.0 + 0.1 * jax.random.normal(kg1, (C,), dtype=jnp.float32)
    beta1 = 0.1 * jax.random.normal(kb1, (C,), dtype=jnp.float32)
    gamma2 = 1.0 + 0.1 * jax.random.normal(kg2, (C,), dtype=jnp.float32)
    beta2 = 0.1 * jax.random.normal(kb2, (C,), dtype=jnp.float32)

    out = resblock1x1_pallas(x, w1, gamma1, beta1, w2, gamma2, beta2)
    out = jax.block_until_ready(out)

    ref = resblock1x1_reference(x, w1, gamma1, beta1, w2, gamma2, beta2)
    assert out.shape == (N, C, H, W)
    max_err = float(jnp.max(jnp.abs(out - ref)))
    assert jnp.allclose(out, ref, atol=1e-3, rtol=1e-3), \
        f"mismatch vs JAX reference, max|diff|={max_err}"

    print("KERNEL_OK")
</pallas_src>

<mosaic_0001>
module attributes {stable_mosaic.version = 11 : i64} {
  func.func @_resblock1x1_kernel(%arg0: memref<2x32x256xf32, #tpu.memory_space<vmem>>, %arg1: memref<32x32xf32, #tpu.memory_space<vmem>>, %arg2: memref<32x1xf32, #tpu.memory_space<vmem>>, %arg3: memref<32x1xf32, #tpu.memory_space<vmem>>, %arg4: memref<32x32xf32, #tpu.memory_space<vmem>>, %arg5: memref<32x1xf32, #tpu.memory_space<vmem>>, %arg6: memref<32x1xf32, #tpu.memory_space<vmem>>, %arg7: memref<2x32x256xf32, #tpu.memory_space<vmem>>, %arg8: memref<32x512xf32, #tpu.memory_space<vmem>>, %arg9: memref<32x512xf32, #tpu.memory_space<vmem>>) attributes {dimension_semantics = [], scalar_prefetch = 0 : i64, scratch_operands = 2 : i64, tpu.core_type = #tpu.core_type<tc>} {
    %c0 = arith.constant 0 : index
    %c0_0 = arith.constant 0 : index
    %c0_1 = arith.constant 0 : index
    %0 = vector.load %arg0[%c0, %c0_0, %c0_1] : memref<2x32x256xf32, #tpu.memory_space<vmem>>, vector<1x32x256xf32>
    %1 = vector.shape_cast %0 : vector<1x32x256xf32> to vector<32x256xf32>
    %c0_2 = arith.constant 0 : index
    %c0_3 = arith.constant 0 : index
    %2 = vector.load %arg8[%c0_2, %c0_3] : memref<32x512xf32, #tpu.memory_space<vmem>>, vector<32x256xf32>
    tpu.vector_store %arg8[%c0_2, %c0_3], %1 {strides = array<i32>} : memref<32x512xf32, #tpu.memory_space<vmem>>, vector<32x256xf32>,
    %c1 = arith.constant 1 : index
    %c0_4 = arith.constant 0 : index
    %c0_5 = arith.constant 0 : index
    %3 = vector.load %arg0[%c1, %c0_4, %c0_5] : memref<2x32x256xf32, #tpu.memory_space<vmem>>, vector<1x32x256xf32>
    %4 = vector.shape_cast %3 : vector<1x32x256xf32> to vector<32x256xf32>
    %c0_6 = arith.constant 0 : index
    %c256 = arith.constant 256 : index
    %5 = vector.load %arg8[%c0_6, %c256] : memref<32x512xf32, #tpu.memory_space<vmem>>, vector<32x256xf32>
    tpu.vector_store %arg8[%c0_6, %c256], %4 {strides = array<i32>} : memref<32x512xf32, #tpu.memory_space<vmem>>, vector<32x256xf32>,
    %c0_7 = arith.constant 0 : index
    %c0_8 = arith.constant 0 : index
    %6 = vector.load %arg1[%c0_7, %c0_8] : memref<32x32xf32, #tpu.memory_space<vmem>>, vector<32x32xf32>
    %c0_9 = arith.constant 0 : index
    %c0_10 = arith.constant 0 : index
    %7 = vector.load %arg8[%c0_9, %c0_10] : memref<32x512xf32, #tpu.memory_space<vmem>>, vector<32x512xf32>
    %cst = arith.constant dense<0.000000e+00> : vector<32x512xf32>
    %8 = tpu.matmul %6, %7, %cst {dimension_numbers = #tpu.dot_dimension_numbers<[1], [0], [0], [1], [0, 0, 1, 1], [], []>} : vector<32x32xf32>, vector<32x512xf32>, vector<32x512xf32> -> vector<32x512xf32>
    %c0_11 = arith.constant 0 : index
    %c0_12 = arith.constant 0 : index
    %9 = vector.load %arg9[%c0_11, %c0_12] : memref<32x512xf32, #tpu.memory_space<vmem>>, vector<32x512xf32>
    tpu.vector_store %arg9[%c0_11, %c0_12], %8 {strides = array<i32>} : memref<32x512xf32, #tpu.memory_space<vmem>>, vector<32x512xf32>,
    %c0_13 = arith.constant 0 : index
    %c0_14 = arith.constant 0 : index
    %10 = vector.load %arg9[%c0_13, %c0_14] : memref<32x512xf32, #tpu.memory_space<vmem>>, vector<32x512xf32>
    %cst_15 = arith.constant dense<0.000000e+00> : vector<32xf32>
    %11 = vector.multi_reduction <add>, %10, %cst_15 [1] : vector<32x512xf32> to vector<32xf32>
    %12 = vector.shape_cast %11 : vector<32xf32> to vector<32x1xf32>
    %cst_16 = arith.constant 0.001953125 : f32
    %13 = vector.broadcast %cst_16 : f32 to vector<32x1xf32>
    %14 = arith.mulf %12, %13 : vector<32x1xf32>
    %c0_17 = arith.constant 0 : index
    %c0_18 = arith.constant 0 : index
    %15 = vector.load %arg9[%c0_17, %c0_18] : memref<32x512xf32, #tpu.memory_space<vmem>>, vector<32x512xf32>
    %16 = vector.broadcast %14 : vector<32x1xf32> to vector<32x512xf32>
    %17 = arith.subf %15, %16 : vector<32x512xf32>
    %18 = arith.mulf %17, %17 : vector<32x512xf32>
    %cst_19 = arith.constant dense<0.000000e+00> : vector<32xf32>
    %19 = vector.multi_reduction <add>, %18, %cst_19 [1] : vector<32x512xf32> to vector<32xf32>
    %20 = vector.shape_cast %19 : vector<32xf32> to vector<32x1xf32>
    %cst_20 = arith.constant 0.001953125 : f32
    %21 = vector.broadcast %cst_20 : f32 to vector<32x1xf32>
    %22 = arith.mulf %20, %21 : vector<32x1xf32>
    %cst_21 = arith.constant 9.99999974E-6 : f32
    %23 = vector.broadcast %cst_21 : f32 to vector<32x1xf32>
    %24 = arith.addf %22, %23 : vector<32x1xf32>
    %25 = math.rsqrt %24 : vector<32x1xf32>
    %c0_22 = arith.constant 0 : index
    %c0_23 = arith.constant 0 : index
    %26 = vector.load %arg2[%c0_22, %c0_23] : memref<32x1xf32, #tpu.memory_space<vmem>>, vector<32x1xf32>
    %27 = arith.mulf %25, %26 : vector<32x1xf32>
    %c0_24 = arith.constant 0 : index
    %c0_25 = arith.constant 0 : index
    %28 = vector.load %arg3[%c0_24, %c0_25] : memref<32x1xf32, #tpu.memory_space<vmem>>, vector<32x1xf32>
    %29 = arith.mulf %14, %27 : vector<32x1xf32>
    %30 = arith.subf %28, %29 : vector<32x1xf32>
    %c0_26 = arith.constant 0 : index
    %c0_27 = arith.constant 0 : index
    %31 = vector.load %arg9[%c0_26, %c0_27] : memref<32x512xf32, #tpu.memory_space<vmem>>, vector<32x512xf32>
    %32 = vector.broadcast %27 : vector<32x1xf32> to vector<32x512xf32>
    %33 = arith.mulf %31, %32 : vector<32x512xf32>
    %34 = vector.broadcast %30 : vector<32x1xf32> to vector<32x512xf32>
    %35 = arith.addf %33, %34 : vector<32x512xf32>
    %cst_28 = arith.constant 0.000000e+00 : f32
    %36 = vector.broadcast %cst_28 : f32 to vector<32x512xf32>
    %37 = arith.maximumf %35, %36 : vector<32x512xf32>
    %c0_29 = arith.constant 0 : index
    %c0_30 = arith.constant 0 : index
    %38 = vector.load %arg4[%c0_29, %c0_30] : memref<32x32xf32, #tpu.memory_space<vmem>>, vector<32x32xf32>
    %cst_31 = arith.constant dense<0.000000e+00> : vector<32x512xf32>
    %39 = tpu.matmul %38, %37, %cst_31 {dimension_numbers = #tpu.dot_dimension_numbers<[1], [0], [0], [1], [0, 0, 1, 1], [], []>} : vector<32x32xf32>, vector<32x512xf32>, vector<32x512xf32> -> vector<32x512xf32>
    %c0_32 = arith.constant 0 : index
    %c0_33 = arith.constant 0 : index
    %40 = vector.load %arg9[%c0_32, %c0_33] : memref<32x512xf32, #tpu.memory_space<vmem>>, vector<32x512xf32>
    tpu.vector_store %arg9[%c0_32, %c0_33], %39 {strides = array<i32>} : memref<32x512xf32, #tpu.memory_space<vmem>>, vector<32x512xf32>,
    %c0_34 = arith.constant 0 : index
    %c0_35 = arith.constant 0 : index
    %41 = vector.load %arg9[%c0_34, %c0_35] : memref<32x512xf32, #tpu.memory_space<vmem>>, vector<32x512xf32>
    %cst_36 = arith.constant dense<0.000000e+00> : vector<32xf32>
    %42 = vector.multi_reduction <add>, %41, %cst_36 [1] : vector<32x512xf32> to vector<32xf32>
    %43 = vector.shape_cast %42 : vector<32xf32> to vector<32x1xf32>
    %cst_37 = arith.constant 0.001953125 : f32
    %44 = vector.broadcast %cst_37 : f32 to vector<32x1xf32>
    %45 = arith.mulf %43, %44 : vector<32x1xf32>
    %c0_38 = arith.constant 0 : index
    %c0_39 = arith.constant 0 : index
    %46 = vector.load %arg9[%c0_38, %c0_39] : memref<32x512xf32, #tpu.memory_space<vmem>>, vector<32x512xf32>
    %47 = vector.broadcast %45 : vector<32x1xf32> to vector<32x512xf32>
    %48 = arith.subf %46, %47 : vector<32x512xf32>
    %49 = arith.mulf %48, %48 : vector<32x512xf32>
    %cst_40 = arith.constant dense<0.000000e+00> : vector<32xf32>
    %50 = vector.multi_reduction <add>, %49, %cst_40 [1] : vector<32x512xf32> to vector<32xf32>
    %51 = vector.shape_cast %50 : vector<32xf32> to vector<32x1xf32>
    %cst_41 = arith.constant 0.001953125 : f32
    %52 = vector.broadcast %cst_41 : f32 to vector<32x1xf32>
    %53 = arith.mulf %51, %52 : vector<32x1xf32>
    %cst_42 = arith.constant 9.99999974E-6 : f32
    %54 = vector.broadcast %cst_42 : f32 to vector<32x1xf32>
    %55 = arith.addf %53, %54 : vector<32x1xf32>
    %56 = math.rsqrt %55 : vector<32x1xf32>
    %c0_43 = arith.constant 0 : index
    %c0_44 = arith.constant 0 : index
    %57 = vector.load %arg5[%c0_43, %c0_44] : memref<32x1xf32, #tpu.memory_space<vmem>>, vector<32x1xf32>
    %58 = arith.mulf %56, %57 : vector<32x1xf32>
    %c0_45 = arith.constant 0 : index
    %c0_46 = arith.constant 0 : index
    %59 = vector.load %arg6[%c0_45, %c0_46] : memref<32x1xf32, #tpu.memory_space<vmem>>, vector<32x1xf32>
    %60 = arith.mulf %45, %58 : vector<32x1xf32>
    %61 = arith.subf %59, %60 : vector<32x1xf32>
    %c0_47 = arith.constant 0 : index
    %c0_48 = arith.constant 0 : index
    %62 = vector.load %arg8[%c0_47, %c0_48] : memref<32x512xf32, #tpu.memory_space<vmem>>, vector<32x512xf32>
    %c0_49 = arith.constant 0 : index
    %c0_50 = arith.constant 0 : index
    %63 = vector.load %arg9[%c0_49, %c0_50] : memref<32x512xf32, #tpu.memory_space<vmem>>, vector<32x512xf32>
    %64 = vector.broadcast %58 : vector<32x1xf32> to vector<32x512xf32>
    %65 = arith.mulf %63, %64 : vector<32x512xf32>
    %66 = arith.addf %62, %65 : vector<32x512xf32>
    %67 = vector.broadcast %61 : vector<32x1xf32> to vector<32x512xf32>
    %68 = arith.addf %66, %67 : vector<32x512xf32>
    %cst_51 = arith.constant 0.000000e+00 : f32
    %69 = vector.broadcast %cst_51 : f32 to vector<32x512xf32>
    %70 = arith.maximumf %68, %69 : vector<32x512xf32>
    %71 = vector.extract_strided_slice %70 {offsets = [0, 0], sizes = [32, 256], strides = [1, 1]} : vector<32x512xf32> to vector<32x256xf32>
    %c0_52 = arith.constant 0 : index
    %c0_53 = arith.constant 0 : index
    %c0_54 = arith.constant 0 : index
    %72 = vector.load %arg7[%c0_52, %c0_53, %c0_54] : memref<2x32x256xf32, #tpu.memory_space<vmem>>, vector<1x32x256xf32>
    %73 = vector.shape_cast %72 : vector<1x32x256xf32> to vector<32x256xf32>
    %74 = vector.shape_cast %71 : vector<32x256xf32> to vector<1x32x256xf32>
    tpu.vector_store %arg7[%c0_52, %c0_53, %c0_54], %74 {strides = array<i32>} : memref<2x32x256xf32, #tpu.memory_space<vmem>>, vector<1x32x256xf32>,
    %75 = vector.extract_strided_slice %70 {offsets = [0, 256], sizes = [32, 256], strides = [1, 1]} : vector<32x512xf32> to vector<32x256xf32>
    %c1_55 = arith.constant 1 : index
    %c0_56 = arith.constant 0 : index
    %c0_57 = arith.constant 0 : index
    %76 = vector.load %arg7[%c1_55, %c0_56, %c0_57] : memref<2x32x256xf32, #tpu.memory_space<vmem>>, vector<1x32x256xf32>
    %77 = vector.shape_cast %76 : vector<1x32x256xf32> to vector<32x256xf32>
    %78 = vector.shape_cast %75 : vector<32x256xf32> to vector<1x32x256xf32>
    tpu.vector_store %arg7[%c1_55, %c0_56, %c0_57], %78 {strides = array<i32>} : memref<2x32x256xf32, #tpu.memory_space<vmem>>, vector<1x32x256xf32>,
    return
  }
}

</mosaic_0001>

<bundles_post_ra>
// kernel: tpu_custom_call.1
= control target key start
LH: loop header
LB: loop body
LE: loop exit
PB: predicated region body
PF: predicated region fallthrough
CT: control target
= control target key end

     0   :  { %12 = vsyncpa [#allocation5], 0  ;;  %s1599_s0 = inlined_call_operand.vmem [shape: f32[2,32,256], index: 0, kind: input, shape index: {}]   ;;  %s1600_s1 = inlined_call_operand.hbm [shape: f32[32,32], index: 1, kind: input, shape index: {}]   ;;  %s1601_s2 = inlined_call_operand.vmem [shape: f32[32,1], index: 2, kind: input, shape index: {}]   ;;  %s1602_s3 = inlined_call_operand.vmem [shape: f32[32,1], index: 3, kind: input, shape index: {}]   ;;  %s1603_s4 = inlined_call_operand.hbm [shape: f32[32,32], index: 4, kind: input, shape index: {}]   ;;  %s1604_s5 = inlined_call_operand.vmem [shape: f32[32,1], index: 5, kind: input, shape index: {}]   ;;  %s1605_s6 = inlined_call_operand.vmem [shape: f32[32,1], index: 6, kind: input, shape index: {}]   ;;  %s1606_s7 = inlined_call_operand.hbm [shape: f32[2,32,256], index: 7, kind: output, shape index: {}]  }
   0x1   :  { %13 = vsyncpa [#allocation8], 0 }
   0x2   :  { %14 = vsyncpa [#allocation6], 0  ;;  %s1133_s24 = smov [#allocation4]  }
   0x3   :  { %s22_s25 = sshll.u32 %s1133_s24, 4  ;;  %s23_s25 = int_to_ptr.vmem [resolvable:$true] %s22_s25 }
   0x4   :  { %s1075_s26 = scalar_lea.vmem %s23_s25, 512  ;;  %p1080_p1 = scmp.lt.s32.totalorder %s23_s25, %s23_s25 }
   0x5   :  { %p1076_p0 = scmp.ne.s32.totalorder %s23_s25, %s1075_s26  ;;  %p1081_p2 = scmp.lt.s32.totalorder %s1075_s26, %s1075_s26 }
   0x7   :  { %p1082_p3 = por %p1081_p2, %p1080_p1 }
   0x9   :  { %p1083_p4 = pnand %p1082_p3, %p1076_p0 }
   0xb   :  { %1086 = shalt.err (!%p1083_p4)
}
   0xc   :  { %s1134_s27 = smov 128   ;;  %s1135_s28 = smov 8  }
   0xd   :  { %28 = dma.hbm_to_vmem [thread:$0]  %s1600_s1, 512, %s23_s25, [#allocation5], %s1134_s27, %s1134_s27, %s1135_s28  }
   0xe   :  { %s1136_s8 = smov [#allocation7]  }
   0xf   :  { %s38_s9 = sshll.u32 %s1136_s8, 4  ;;  %s39_s9 = int_to_ptr.vmem [resolvable:$true] %s38_s9 }
  0x10   :  { %s1095_s10 = scalar_lea.vmem %s39_s9, 512  ;;  %p1100_p6 = scmp.lt.s32.totalorder %s39_s9, %s39_s9 }
  0x11   :  { %p1096_p5 = scmp.ne.s32.totalorder %s39_s9, %s1095_s10  ;;  %p1101_p7 = scmp.lt.s32.totalorder %s1095_s10, %s1095_s10 }
  0x13   :  { %p1102_p8 = por %p1101_p7, %p1100_p6 }
  0x15   :  { %p1103_p9 = pnand %p1102_p8, %p1096_p5 }
  0x17   :  { %1106 = shalt.err (!%p1103_p9)
}
  0x18   :  { %44 = dma.hbm_to_vmem [thread:$0]  %s1603_s4, 512, %s39_s9, [#allocation8], %s1134_s27, %s1134_s27, %s1135_s28  }
  0x19   :  { %1127 = dma.done.wait [#allocation5], 512  }
  0x1a   :  { %1128 = vsyncadd [#allocation5], 4294966784 }
  0x1b   :  { %1129 = dma.done.wait [#allocation8], 512  }
  0x1c   :  { %1130 = vsyncadd [#allocation8], 4294966784  ;;  %v1137_v0 = vmov 0.0   ;;  %v1193_v1 = vld [vmem:[%s1599_s0 + $0x38] sm:$0xff]  ;;  %v1198_v2 = vld [vmem:[%s1599_s0 + $0x30] sm:$0xff]  ;;  %vm108_vm0 = vcmask 261120  }
  0x1d   :  { %185 = vmatprep.mubr.f32.mxu0 %v1137_v0  ;;  %274 = vmatprep.mubr.f32.mxu1 %v1137_v0  ;;  %v1203_v3 = vld [vmem:[%s1599_s0 + $0x28] sm:$0xff]  ;;  %v1209_v4 = vld [vmem:[%s1599_s0 + $0x78] sm:$0xff]  ;;  %v1214_v5 = vld [vmem:[%s1599_s0 + $0x20] sm:$0xff] }
  0x1e   :  { %145 = vmatprep.subr.mxu0 %v1193_v1  ;;  %v1219_v6 = vld [vmem:[%s1599_s0 + $0x70] sm:$0xff]  ;;  %234 = vmatprep.subr.mxu1 %v1209_v4  ;;  %v1226_v7 = vld [vmem:[%s1599_s0 + $0x18] sm:$0xff]  ;;  %v1231_v8 = vld [vmem:[%s1599_s0 + $0x68] sm:$0xff] }
  0x1f   :  { %146 = vmatpush1.msra.mxu0 %v1198_v2  ;;  %235 = vmatpush1.msra.mxu1 %v1219_v6  ;;  %v1238_v9 = vld [vmem:[%s1599_s0 + $0x10] sm:$0xff]  ;;  %v1243_v10 = vld [vmem:[%s1599_s0 + $0x60] sm:$0xff]  ;;  %v1248_v11 = vld [vmem:[%s1599_s0 + $0x58] sm:$0xff] }
  0x20   :  { %147 = vmatprep.subr.mxu0 %v1203_v3  ;;  %236 = vmatprep.subr.mxu1 %v1231_v8  ;;  %v1255_v12 = vld [vmem:[%s1599_s0 + $0x8] sm:$0xff]  ;;  %v1260_v13 = vld [vmem:[%s1599_s0 + $0x50] sm:$0xff]  ;;  %v1267_v14 = vld [vmem:[%s1599_s0] sm:$0xff] }
  0x21   :  { %148 = vmatpush1.msra.mxu0 %v1214_v5  ;;  %237 = vmatpush1.msra.mxu1 %v1243_v10  ;;  %v1272_v15 = vld [vmem:[%s1599_s0 + $0x48] sm:$0xff]  ;;  %v88_v16 = vld [vmem:[#allocation4] sm:$0xff]  ;;  %v90_v19 = vld [vmem:[#allocation4 + $0x10] sm:$0xff] }
  0x22   :  { %149 = vmatprep.subr.mxu0 %v1226_v7  ;;  %238 = vmatprep.subr.mxu1 %v1248_v11  ;;  %v1279_v17 = vld [vmem:[%s1599_s0 + $0x40] sm:$0xff]  ;;  %v89_v18 = vld [vmem:[#allocation4 + $0x8] sm:$0xff]  ;;  %v91_v20 = vld [vmem:[#allocation4 + $0x18] sm:$0xff] }
  0x23   :  { %150 = vmatpush1.msra.mxu0 %v1238_v9  ;;  %239 = vmatpush1.msra.mxu1 %v1260_v13 }
  0x24   :  { %151 = vmatprep.subr.mxu0 %v1255_v12  ;;  %240 = vmatprep.subr.mxu1 %v1272_v15 }
  0x25   :  { %152 = vmatpush1.msra.mxu0 %v1267_v14  ;;  %241 = vmatpush1.msra.mxu1 %v1279_v17 }
  0x26   :  { %1024 = vmatmul.mubr.msk.f32.vlgmr.msra.gmra.mxu0 %vm108_vm0, %v88_v16  ;;  %1028 = vmatmul.mubr.msk.f32.vlgmr.msra.gmra.mxu1 %vm108_vm0, %v88_v16 }
  0x27   :  { %191 = vmatprep.mubr.f32.mxu0 %v1137_v0  ;;  %280 = vmatprep.mubr.f32.mxu1 %v1137_v0 }
  0x2a   :  { %1025 = vmatmul.mubr.msk.f32.gmra.mxu0 %vm108_vm0, %v89_v18  ;;  %1029 = vmatmul.mubr.msk.f32.gmra.mxu1 %vm108_vm0, %v89_v18 }
  0x2b   :  { %197 = vmatprep.mubr.f32.mxu0 %v1137_v0  ;;  %286 = vmatprep.mubr.f32.mxu1 %v1137_v0 }
  0x2e   :  { %1026 = vmatmul.mubr.msk.f32.gmra.mxu0 %vm108_vm0, %v90_v19  ;;  %1030 = vmatmul.mubr.msk.f32.gmra.mxu1 %vm108_vm0, %v90_v19 }
  0x2f   :  { %203 = vmatprep.mubr.f32.mxu0 %v1137_v0  ;;  %292 = vmatprep.mubr.f32.mxu1 %v1137_v0 }
  0x32   :  { %1027 = vmatmul.mubr.msk.f32.gmra.mxu0 %vm108_vm0, %v91_v20  ;;  %1031 = vmatmul.mubr.msk.f32.gmra.mxu1 %vm108_vm0, %v91_v20 }
  0x33   :  { %607 = vmatprep.mubr.f32.mxu0 %v1137_v0  ;;  %696 = vmatprep.mubr.f32.mxu1 %v1137_v0 }
  0xe6   :  { %v1302_v21 = vpop.f32.mrf.mxu0  ;;  %v1304_v22 = vpop.f32.mrf.mxu1 }
  0xe8   :  { %v1306_v23 = vpop.f32.mrf.mxu0  ;;  %v1308_v24 = vpop.f32.mrf.mxu1 }
  0xe9   :  { %v331_v28 = vadd.f32 %v1306_v23, %v1302_v21 }
  0xea   :  { %v1310_v25 = vpop.f32.mrf.mxu0  ;;  %v1312_v26 = vpop.f32.mrf.mxu1 }
  0xeb   :  { %v332_v37 = vadd.f32 %v331_v28, %v1304_v22 }
  0xec   :  { %v1314_v27 = vpop.f32.mrf.mxu0  ;;  %v1320_v30 = vpop.f32.mrf.mxu1 }
  0xed   :  { %v336_v29 = vadd.f32 %v1314_v27, %v1310_v25  ;;  %v333_v43 = vadd.f32 %v332_v37, %v1308_v24 }
  0xee   :  { %v1322_v31 = vpop.f32.mrf.mxu0  ;;  %v1324_v32 = vpop.f32.mrf.mxu1 }
  0xef   :  { %v337_v33 = vadd.f32 %v336_v29, %v1312_v26 }
  0xf0   :  { %v1327_v34 = vpop.f32.mrf.mxu0  ;;  %v1329_v35 = vpop.f32.mrf.mxu1 }
  0xf1   :  { %v338_v36 = vadd.f32 %v337_v33, %v1320_v30  ;;  %v341_v41 = vadd.f32 %v1327_v34, %v1322_v31 }
  0xf2   :  { %v1333_v38 = vpop.f32.mrf.mxu0  ;;  %v1337_v40 = vpop.f32.mrf.mxu1 }
  0xf3   :  { %339 = vadd.xlane.f32.xlu1 %v338_v36  ;;  %v342_v47 = vadd.f32 %v341_v41, %v1324_v32 }
  0xf4   :  { %v1335_v39 = vpop.f32.mrf.mxu0  ;;  %v1345_v45 = vpop.f32.mrf.mxu1 }
  0xf5   :  { %v346_v42 = vadd.f32 %v1335_v39, %v1333_v38  ;;  %v343_v48 = vadd.f32 %v342_v47, %v1329_v35 }
  0xf7   :  { %334 = vadd.xlane.f32.xlu1 %v333_v43  ;;  %v347_v44 = vadd.f32 %v346_v42, %v1337_v40 }
  0xf9   :  { %v348_v46 = vadd.f32 %v347_v44, %v1345_v45 }
  0xfb   :  { %349 = vadd.xlane.f32.xlu0 %v348_v46 }
  0xff   :  { %344 = vadd.xlane.f32.xlu0 %v343_v48 }
 0x17c   :  { %v340_v49 = vpop.xlane.xlu1 %339 }
 0x17d   :  { %v1350_v50 = vmul.f32 0.001953125, %v340_v49 }
 0x17f   :  { %v359_v53 = vsub.f32 %v1310_v25, %v1350_v50  ;;  %v360_v54 = vsub.f32 %v1314_v27, %v1350_v50  ;;  %v361_v19 = vsub.f32 %v1312_v26, %v1350_v50  ;;  %v362_v48 = vsub.f32 %v1320_v30, %v1350_v50 }
 0x180   :  { %v335_v51 = vpop.xlane.xlu1 %334 }
 0x181   :  { %v1352_v52 = vmul.f32 0.001953125, %v335_v51  ;;  %v375_v57 = vmul.f32 %v359_v53, %v359_v53  ;;  %v376_v58 = vmul.f32 %v360_v54, %v360_v54  ;;  %v377_v49 = vmul.f32 %v361_v19, %v361_v19 }
 0x183   :  { %v355_v59 = vsub.f32 %v1302_v21, %v1352_v52  ;;  %v356_v60 = vsub.f32 %v1306_v23, %v1352_v52  ;;  %v392_v36 = vadd.f32 %v376_v58, %v375_v57  ;;  %v357_v51 = vsub.f32 %v1304_v22, %v1352_v52 }
 0x184   :  { %v350_v55 = vpop.xlane.xlu0 %349  ;;  %v358_v19 = vsub.f32 %v1308_v24, %v1352_v52 }
 0x185   :  { %v1358_v56 = vmul.f32 0.001953125, %v350_v55  ;;  %v371_v37 = vmul.f32 %v355_v59, %v355_v59  ;;  %v372_v41 = vmul.f32 %v356_v60, %v356_v60  ;;  %v393_v58 = vadd.f32 %v392_v36, %v377_v49 }
 0x186   :  { %v1138_v36 = vmov 0  }
 0x187   :  { %v367_v61 = vsub.f32 %v1333_v38, %v1358_v56  ;;  %v368_v62 = vsub.f32 %v1335_v39, %v1358_v56  ;;  %v369_v63 = vsub.f32 %v1337_v40, %v1358_v56  ;;  %v370_v18 = vsub.f32 %v1345_v45, %v1358_v56  ;;  %1049 = vset.pattern.permute.xlu0 %v1138_v36 }
 0x188   :  { %v345_v16 = vpop.xlane.xlu0 %344  ;;  %1050 = vset.pattern.permute.xlu1 %v1138_v36 }
 0x189   :  { %v1374_v20 = vmul.f32 0.001953125, %v345_v16  ;;  %v383_v28 = vmul.f32 %v367_v61, %v367_v61  ;;  %v384_v29 = vmul.f32 %v368_v62, %v368_v62  ;;  %v385_v33 = vmul.f32 %v369_v63, %v369_v63 }
 0x18a   :  { %v386_v47 = vmul.f32 %v370_v18, %v370_v18  ;;  %v387_v62 = vadd.f32 %v372_v41, %v371_v37  ;;  %v378_v63 = vmul.f32 %v362_v48, %v362_v48 }
 0x18b   :  { %v402_v42 = vadd.f32 %v384_v29, %v383_v28  ;;  %v363_v43 = vsub.f32 %v1322_v31, %v1374_v20  ;;  %v364_v44 = vsub.f32 %v1327_v34, %v1374_v20  ;;  %v365_v46 = vsub.f32 %v1324_v32, %v1374_v20 }
 0x18c   :  { %v366_v54 = vsub.f32 %v1329_v35, %v1374_v20  ;;  %v373_v28 = vmul.f32 %v357_v51, %v357_v51  ;;  %v394_v29 = vadd.f32 %v393_v58, %v378_v63 }
 0x18d   :  { %v403_v53 = vadd.f32 %v402_v42, %v385_v33  ;;  %v379_v55 = vmul.f32 %v363_v43, %v363_v43  ;;  %v380_v57 = vmul.f32 %v364_v44, %v364_v44  ;;  %v381_v60 = vmul.f32 %v365_v46, %v365_v46 }
 0x18e   :  { %v382_v16 = vmul.f32 %v366_v54, %v366_v54  ;;  %v388_v42 = vadd.f32 %v387_v62, %v373_v28  ;;  %v374_v43 = vmul.f32 %v358_v19, %v358_v19  ;;  %v421_v62 = vld [vmem:[%s1601_s2 + $0x10] sm:$0xff]  ;;  %v420_v19 = vld [vmem:[%s1601_s2 + $0x8] sm:$0xff] }
 0x18f   :  { %v404_v59 = vadd.f32 %v403_v53, %v386_v47  ;;  %v397_v61 = vadd.f32 %v380_v57, %v379_v55 }
 0x190   :  { %v389_v44 = vadd.f32 %v388_v42, %v374_v43 }
 0x191   :  { %405 = vadd.xlane.f32.xlu0 %v404_v59  ;;  %v398_v18 = vadd.f32 %v397_v61, %v381_v60  ;;  %v422_v59 = vld [vmem:[%s1601_s2 + $0x18] sm:$0xff] }
 0x193   :  { %v399_v33 = vadd.f32 %v398_v18, %v382_v16 }
 0x195   :  { %395 = vadd.xlane.f32.xlu0 %v394_v29  ;;  %400 = vadd.xlane.f32.xlu1 %v399_v33  ;;  %v419_v33 = vld [vmem:[%s1601_s2] sm:$0xff] }
 0x199   :  { %390 = vadd.xlane.f32.xlu1 %v389_v44  ;;  %v429_v44 = vld [vmem:[%s1602_s3 + $0x10] sm:$0xff] }
 0x21a   :  { %v406_v37 = vpop.xlane.xlu0 %405 }
 0x21b   :  { %v410_v41 = vmul.f32 0.001953125, %v406_v37 }
 0x21d   :  { %v414_v46 = vadd.f32 1e-05, %v410_v41  ;;  %v430_v41 = vld [vmem:[%s1602_s3 + $0x18] sm:$0xff] }
 0x21e   :  { %v401_v47 = vpop.xlane.xlu1 %400  ;;  %v396_v48 = vpop.xlane.xlu0 %395 }
 0x21f   :  { %1051 = vrsqrt.f32 %v414_v46  ;;  %v409_v49 = vmul.f32 0.001953125, %v401_v47  ;;  %v408_v53 = vmul.f32 0.001953125, %v396_v48 }
 0x221   :  { %v413_v51 = vadd.f32 1e-05, %v409_v49  ;;  %v412_v54 = vadd.f32 1e-05, %v408_v53 }
 0x222   :  { %v391_v55 = vpop.xlane.xlu1 %390 }
 0x223   :  { %1053 = vrsqrt.f32 %v413_v51  ;;  %v407_v57 = vmul.f32 0.001953125, %v391_v55 }
 0x224   :  { %1055 = vrsqrt.f32 %v412_v54 }
 0x225   :  { %v411_v58 = vadd.f32 1e-05, %v407_v57 }
 0x227   :  { %1057 = vrsqrt.f32 %v411_v58 }
 0x22c   :  { %v1052_v60 = vpop.eup %1051 }
 0x22d   :  { %v426_v61 = vmul.f32 %v1052_v60, %v422_v59 }
 0x22f   :  { %456 = vperm.xlu0 %1049, %v426_v61   ;;  %v434_v37 = vmul.f32 %v426_v61, %v1358_v56  ;;  %v427_v56 = vld [vmem:[%s1602_s3] sm:$0xff] }
 0x230   :  { %v1054_v63 = vpop.eup %1053 }
 0x231   :  { %v425_v16 = vmul.f32 %v1054_v63, %v421_v62  ;;  %v1056_v18 = vpop.eup %1055  ;;  %v438_v46 = vsub.f32 %v430_v41, %v434_v37 }
 0x232   :  { %v424_v28 = vmul.f32 %v1056_v18, %v420_v19 }
 0x233   :  { %451 = vperm.xlu1 %1050, %v425_v16   ;;  %v433_v43 = vmul.f32 %v425_v16, %v1374_v20  ;;  %v428_v20 = vld [vmem:[%s1602_s3 + $0x8] sm:$0xff] }
 0x234   :  { %v1058_v29 = vpop.eup %1057  ;;  %v432_v47 = vmul.f32 %v424_v28, %v1350_v50 }
 0x235   :  { %v423_v42 = vmul.f32 %v1058_v29, %v419_v33  ;;  %v437_v36 = vsub.f32 %v429_v44, %v433_v43 }
 0x236   :  { %v436_v48 = vsub.f32 %v428_v20, %v432_v47 }
 0x237   :  { %446 = vperm.xlu1 %1050, %v424_v28   ;;  %v431_v49 = vmul.f32 %v423_v42, %v1352_v52 }
 0x239   :  { %v435_v53 = vsub.f32 %v427_v56, %v431_v49 }
 0x23b   :  { %441 = vperm.xlu1 %1050, %v423_v42  }
 0x23f   :  { %487 = vperm.xlu1 %1050, %v437_v36  }
 0x243   :  { %492 = vperm.xlu1 %1050, %v438_v46  }
 0x247   :  { %482 = vperm.xlu1 %1050, %v436_v48  }
 0x24b   :  { %477 = vperm.xlu1 %1050, %v435_v53  }
 0x2aa   :  { %v457_v57 = vpop.permute.xlu0 %456 }
 0x2ab   :  { %v471_v58 = vmul.f32 %v457_v57, %v1333_v38  ;;  %v472_v52 = vmul.f32 %v457_v57, %v1335_v39  ;;  %v473_v61 = vmul.f32 %v457_v57, %v1337_v40  ;;  %v474_v62 = vmul.f32 %v457_v57, %v1345_v45 }
 0x2ae   :  { %v452_v51 = vpop.permute.xlu1 %451 }
 0x2af   :  { %v468_v59 = vmul.f32 %v452_v51, %v1327_v34  ;;  %v470_v60 = vmul.f32 %v452_v51, %v1329_v35  ;;  %v467_v63 = vmul.f32 %v452_v51, %v1322_v31  ;;  %v469_v16 = vmul.f32 %v452_v51, %v1324_v32 }
 0x2b2   :  { %v447_v54 = vpop.permute.xlu1 %446 }
 0x2b3   :  { %v463_v18 = vmul.f32 %v447_v54, %v1310_v25  ;;  %v464_v35 = vmul.f32 %v447_v54, %v1314_v27  ;;  %v465_v39 = vmul.f32 %v447_v54, %v1312_v26  ;;  %v466_v32 = vmul.f32 %v447_v54, %v1320_v30 }
 0x2b6   :  { %v442_v55 = vpop.permute.xlu1 %441 }
 0x2b7   :  { %v459_v25 = vmul.f32 %v442_v55, %v1302_v21  ;;  %v460_v37 = vmul.f32 %v442_v55, %v1306_v23  ;;  %v461_v48 = vmul.f32 %v442_v55, %v1304_v22  ;;  %v462_v30 = vmul.f32 %v442_v55, %v1308_v24 }
 0x2ba   :  { %v488_v50 = vpop.permute.xlu1 %487 }
 0x2bb   :  { %v504_v28 = vadd.f32 %v488_v50, %v468_v59  ;;  %v506_v29 = vadd.f32 %v488_v50, %v470_v60  ;;  %v503_v40 = vadd.f32 %v488_v50, %v467_v63  ;;  %v505_v43 = vadd.f32 %v488_v50, %v469_v16  ;;  %v529_v63 = vld [vmem:[#allocation7 + $0x10] sm:$0xff]  ;;  %v530_v16 = vld [vmem:[#allocation7 + $0x18] sm:$0xff] }
 0x2bd   :  { %v520_v46 = vmax.f32 %v504_v28, 0.0  ;;  %v522_v27 = vmax.f32 %v506_v29, 0.0  ;;  %v519_v49 = vmax.f32 %v503_v40, 0.0  ;;  %v521_v56 = vmax.f32 %v505_v43, 0.0 }
 0x2be   :  { %v493_v19 = vpop.permute.xlu1 %492 }
 0x2bf   :  { %v507_v38 = vadd.f32 %v493_v19, %v471_v58  ;;  %v509_v33 = vadd.f32 %v493_v19, %v473_v61  ;;  %v508_v34 = vadd.f32 %v493_v19, %v472_v52  ;;  %v510_v42 = vadd.f32 %v493_v19, %v474_v62  ;;  %v527_v61 = vld [vmem:[#allocation7] sm:$0xff]  ;;  %v528_v62 = vld [vmem:[#allocation7 + $0x8] sm:$0xff] }
 0x2c1   :  { %v523_v45 = vmax.f32 %v507_v38, 0.0  ;;  %v525_v44 = vmax.f32 %v509_v33, 0.0  ;;  %v524_v31 = vmax.f32 %v508_v34, 0.0  ;;  %v526_v36 = vmax.f32 %v510_v42, 0.0 }
 0x2c2   :  { %v483_v41 = vpop.permute.xlu1 %482 }
 0x2c3   :  { %v499_v47 = vadd.f32 %v483_v41, %v463_v18  ;;  %v501_v20 = vadd.f32 %v483_v41, %v465_v39  ;;  %567 = vmatprep.subr.mxu0 %v524_v31  ;;  %656 = vmatprep.subr.mxu1 %v526_v36  ;;  %v500_v26 = vadd.f32 %v483_v41, %v464_v35 }
 0x2c4   :  { %568 = vmatpush1.msra.mxu0 %v523_v45  ;;  %657 = vmatpush1.msra.mxu1 %v525_v44  ;;  %v502_v53 = vadd.f32 %v483_v41, %v466_v32 }
 0x2c5   :  { %v515_v21 = vmax.f32 %v499_v47, 0.0  ;;  %v517_v51 = vmax.f32 %v501_v20, 0.0  ;;  %569 = vmatprep.subr.mxu0 %v520_v46  ;;  %658 = vmatprep.subr.mxu1 %v522_v27  ;;  %v516_v23 = vmax.f32 %v500_v26, 0.0 }
 0x2c6   :  { %v478_v54 = vpop.permute.xlu1 %477  ;;  %570 = vmatpush1.msra.mxu0 %v519_v49  ;;  %659 = vmatpush1.msra.mxu1 %v521_v56  ;;  %v518_v57 = vmax.f32 %v502_v53, 0.0 }
 0x2c7   :  { %v495_v50 = vadd.f32 %v478_v54, %v459_v25  ;;  %v497_v58 = vadd.f32 %v478_v54, %v461_v48  ;;  %571 = vmatprep.subr.mxu0 %v516_v23  ;;  %v496_v22 = vadd.f32 %v478_v54, %v460_v37  ;;  %v498_v59 = vadd.f32 %v478_v54, %v462_v30 }
 0x2c8   :  { %660 = vmatprep.subr.mxu1 %v518_v57  ;;  %572 = vmatpush1.msra.mxu0 %v515_v21 }
 0x2c9   :  { %v511_v60 = vmax.f32 %v495_v50, 0.0  ;;  %v513_v52 = vmax.f32 %v497_v58, 0.0  ;;  %661 = vmatpush1.msra.mxu1 %v517_v51  ;;  %v512_v24 = vmax.f32 %v496_v22, 0.0  ;;  %v514_v55 = vmax.f32 %v498_v59, 0.0 }
 0x2cb   :  { %573 = vmatprep.subr.mxu0 %v512_v24  ;;  %662 = vmatprep.subr.mxu1 %v514_v55 }
 0x2cc   :  { %574 = vmatpush1.msra.mxu0 %v511_v60  ;;  %663 = vmatpush1.msra.mxu1 %v513_v52 }
 0x2cd   :  { %1032 = vmatmul.mubr.msk.f32.vlgmr.msra.gmra.mxu0 %vm108_vm0, %v527_v61  ;;  %1036 = vmatmul.mubr.msk.f32.vlgmr.msra.gmra.mxu1 %vm108_vm0, %v527_v61 }
 0x2ce   :  { %613 = vmatprep.mubr.f32.mxu0 %v1137_v0  ;;  %702 = vmatprep.mubr.f32.mxu1 %v1137_v0 }
 0x2d1   :  { %1033 = vmatmul.mubr.msk.f32.gmra.mxu0 %vm108_vm0, %v528_v62  ;;  %1037 = vmatmul.mubr.msk.f32.gmra.mxu1 %vm108_vm0, %v528_v62 }
 0x2d2   :  { %619 = vmatprep.mubr.f32.mxu0 %v1137_v0  ;;  %708 = vmatprep.mubr.f32.mxu1 %v1137_v0 }
 0x2d5   :  { %1034 = vmatmul.mubr.msk.f32.gmra.mxu0 %vm108_vm0, %v529_v63  ;;  %1038 = vmatmul.mubr.msk.f32.gmra.mxu1 %vm108_vm0, %v529_v63 }
 0x2d6   :  { %625 = vmatprep.mubr.f32.mxu0 %v1137_v0  ;;  %714 = vmatprep.mubr.f32.mxu1 %v1137_v0 }
 0x2d9   :  { %1035 = vmatmul.mubr.msk.f32.gmra.mxu0 %vm108_vm0, %v530_v16  ;;  %1039 = vmatmul.mubr.msk.f32.gmra.mxu1 %vm108_vm0, %v530_v16 }
 0x38d   :  { %v1448_v18 = vpop.f32.mrf.mxu0  ;;  %v1450_v19 = vpop.f32.mrf.mxu1 }
 0x38f   :  { %v1452_v28 = vpop.f32.mrf.mxu0  ;;  %v1454_v29 = vpop.f32.mrf.mxu1 }
 0x390   :  { %v753_v38 = vadd.f32 %v1452_v28, %v1448_v18 }
 0x391   :  { %v1458_v33 = vpop.f32.mrf.mxu0  ;;  %v1460_v34 = vpop.f32.mrf.mxu1 }
 0x392   :  { %v754_v0 = vadd.f32 %v753_v38, %v1450_v19 }
 0x393   :  { %v1463_v42 = vpop.f32.mrf.mxu0  ;;  %v1465_v35 = vpop.f32.mrf.mxu1 }
 0x394   :  { %v758_v39 = vadd.f32 %v1463_v42, %v1458_v33  ;;  %v755_v40 = vadd.f32 %v754_v0, %v1454_v29 }
 0x395   :  { %v1470_v43 = vpop.f32.mrf.mxu0  ;;  %v1472_v45 = vpop.f32.mrf.mxu1 }
 0x396   :  { %756 = vadd.xlane.f32.xlu1 %v755_v40  ;;  %v759_v44 = vadd.f32 %v758_v39, %v1460_v34 }
 0x397   :  { %v1475_v31 = vpop.f32.mrf.mxu0  ;;  %v1477_v36 = vpop.f32.mrf.mxu1 }
 0x398   :  { %v763_v32 = vadd.f32 %v1475_v31, %v1470_v43  ;;  %v760_v25 = vadd.f32 %v759_v44, %v1465_v35 }
 0x399   :  { %v1482_v37 = vpop.f32.mrf.mxu0  ;;  %v1487_v47 = vpop.f32.mrf.mxu1 }
 0x39a   :  { %761 = vadd.xlane.f32.xlu0 %v760_v25  ;;  %v764_v41 = vadd.f32 %v763_v32, %v1472_v45 }
 0x39b   :  { %v1485_v46 = vpop.f32.mrf.mxu0  ;;  %v1493_v48 = vpop.f32.mrf.mxu1 }
 0x39c   :  { %v768_v20 = vadd.f32 %v1485_v46, %v1482_v37  ;;  %v765_v27 = vadd.f32 %v764_v41, %v1477_v36 }
 0x39e   :  { %766 = vadd.xlane.f32.xlu0 %v765_v27  ;;  %v769_v26 = vadd.f32 %v768_v20, %v1487_v47 }
 0x3a0   :  { %v770_v49 = vadd.f32 %v769_v26, %v1493_v48 }
 0x3a2   :  { %771 = vadd.xlane.f32.xlu1 %v770_v49 }
 0x41f   :  { %v757_v56 = vpop.xlane.xlu1 %756 }
 0x420   :  { %v1496_v53 = vmul.f32 0.001953125, %v757_v56 }
 0x422   :  { %v777_v30 = vsub.f32 %v1448_v18, %v1496_v53  ;;  %v778_v21 = vsub.f32 %v1452_v28, %v1496_v53  ;;  %v779_v51 = vsub.f32 %v1450_v19, %v1496_v53  ;;  %v780_v54 = vsub.f32 %v1454_v29, %v1496_v53 }
 0x423   :  { %v762_v23 = vpop.xlane.xlu0 %761 }
 0x424   :  { %v1506_v57 = vmul.f32 0.001953125, %v762_v23  ;;  %v793_v50 = vmul.f32 %v777_v30, %v777_v30  ;;  %v794_v58 = vmul.f32 %v778_v21, %v778_v21  ;;  %v795_v22 = vmul.f32 %v779_v51, %v779_v51 }
 0x425   :  { %v796_v61 = vmul.f32 %v780_v54, %v780_v54 }
 0x426   :  { %v809_v59 = vadd.f32 %v794_v58, %v793_v50  ;;  %v781_v60 = vsub.f32 %v1458_v33, %v1506_v57  ;;  %v782_v52 = vsub.f32 %v1463_v42, %v1506_v57  ;;  %v783_v24 = vsub.f32 %v1460_v34, %v1506_v57 }
 0x427   :  { %v767_v55 = vpop.xlane.xlu0 %766  ;;  %v784_v62 = vsub.f32 %v1465_v35, %v1506_v57 }
 0x428   :  { %v1516_v63 = vmul.f32 0.001953125, %v767_v55  ;;  %v810_v16 = vadd.f32 %v809_v59, %v795_v22  ;;  %v797_v38 = vmul.f32 %v781_v60, %v781_v60  ;;  %v798_v0 = vmul.f32 %v782_v52, %v782_v52 }
 0x429   :  { %v799_v39 = vmul.f32 %v783_v24, %v783_v24  ;;  %v800_v20 = vmul.f32 %v784_v62, %v784_v62 }
 0x42a   :  { %v811_v40 = vadd.f32 %v810_v16, %v796_v61  ;;  %v814_v44 = vadd.f32 %v798_v0, %v797_v38  ;;  %v785_v32 = vsub.f32 %v1470_v43, %v1516_v63  ;;  %v786_v25 = vsub.f32 %v1475_v31, %v1516_v63 }
 0x42b   :  { %v772_v41 = vpop.xlane.xlu1 %771  ;;  %v787_v27 = vsub.f32 %v1472_v45, %v1516_v63  ;;  %v788_v26 = vsub.f32 %v1477_v36, %v1516_v63 }
 0x42c   :  { %v1526_v49 = vmul.f32 0.001953125, %v772_v41  ;;  %812 = vadd.xlane.f32.xlu0 %v811_v40  ;;  %v815_v56 = vadd.f32 %v814_v44, %v799_v39  ;;  %v801_v30 = vmul.f32 %v785_v32, %v785_v32  ;;  %v802_v21 = vmul.f32 %v786_v25, %v786_v25 }
 0x42d   :  { %v803_v51 = vmul.f32 %v787_v27, %v787_v27  ;;  %v804_v22 = vmul.f32 %v788_v26, %v788_v26 }
 0x42e   :  { %v816_v23 = vadd.f32 %v815_v56, %v800_v20  ;;  %v819_v54 = vadd.f32 %v802_v21, %v801_v30  ;;  %v789_v50 = vsub.f32 %v1482_v37, %v1526_v49  ;;  %v790_v58 = vsub.f32 %v1485_v46, %v1526_v49 }
 0x42f   :  { %v791_v59 = vsub.f32 %v1487_v47, %v1526_v49  ;;  %v792_v52 = vsub.f32 %v1493_v48, %v1526_v49 }
 0x430   :  { %817 = vadd.xlane.f32.xlu1 %v816_v23  ;;  %v820_v60 = vadd.f32 %v819_v54, %v803_v51  ;;  %v805_v24 = vmul.f32 %v789_v50, %v789_v50  ;;  %v806_v55 = vmul.f32 %v790_v58, %v790_v58  ;;  %v841_v23 = vld [vmem:[%s1604_s5] sm:$0xff]  ;;  %v842_v58 = vld [vmem:[%s1604_s5 + $0x8] sm:$0xff] }
 0x431   :  { %v807_v62 = vmul.f32 %v791_v59, %v791_v59  ;;  %v808_v38 = vmul.f32 %v792_v52, %v792_v52  ;;  %v849_v52 = vld [vmem:[%s1605_s6] sm:$0xff] }
 0x432   :  { %v821_v61 = vadd.f32 %v820_v60, %v804_v22  ;;  %v824_v16 = vadd.f32 %v806_v55, %v805_v24  ;;  %v850_v24 = vld [vmem:[%s1605_s6 + $0x8] sm:$0xff]  ;;  %v843_v55 = vld [vmem:[%s1604_s5 + $0x10] sm:$0xff] }
 0x434   :  { %822 = vadd.xlane.f32.xlu0 %v821_v61  ;;  %v825_v0 = vadd.f32 %v824_v16, %v807_v62 }
 0x436   :  { %v826_v39 = vadd.f32 %v825_v0, %v808_v38 }
 0x438   :  { %827 = vadd.xlane.f32.xlu1 %v826_v39 }
 0x4b5   :  { %v813_v40 = vpop.xlane.xlu0 %812 }
 0x4b6   :  { %v829_v44 = vmul.f32 0.001953125, %v813_v40 }
 0x4b8   :  { %v833_v32 = vadd.f32 1e-05, %v829_v44 }
 0x4b9   :  { %v818_v25 = vpop.xlane.xlu1 %817 }
 0x4ba   :  { %1059 = vrsqrt.f32 %v833_v32  ;;  %v830_v41 = vmul.f32 0.001953125, %v818_v25  ;;  %v851_v32 = vld [vmem:[%s1605_s6 + $0x10] sm:$0xff] }
 0x4bc   :  { %v834_v20 = vadd.f32 1e-05, %v830_v41 }
 0x4bd   :  { %v823_v27 = vpop.xlane.xlu0 %822 }
 0x4be   :  { %1061 = vrsqrt.f32 %v834_v20  ;;  %v831_v26 = vmul.f32 0.001953125, %v823_v27 }
 0x4c0   :  { %v835_v56 = vadd.f32 1e-05, %v831_v26 }
 0x4c1   :  { %v828_v30 = vpop.xlane.xlu1 %827 }
 0x4c2   :  { %1063 = vrsqrt.f32 %v835_v56  ;;  %v832_v21 = vmul.f32 0.001953125, %v828_v30 }
 0x4c4   :  { %v836_v51 = vadd.f32 1e-05, %v832_v21 }
 0x4c6   :  { %1065 = vrsqrt.f32 %v836_v51 }
 0x4c7   :  { %v1060_v54 = vpop.eup %1059 }
 0x4c8   :  { %v845_v50 = vmul.f32 %v1060_v54, %v841_v23 }
 0x4ca   :  { %879 = vperm.xlu0 %1049, %v845_v50   ;;  %v853_v60 = vmul.f32 %v845_v50, %v1496_v53  ;;  %v844_v53 = vld [vmem:[%s1604_s5 + $0x18] sm:$0xff]  ;;  %s1139_s5 = smov [#allocation9]  }
 0x4cb   :  { %v1062_v22 = vpop.eup %1061 }
 0x4cc   :  { %v846_v59 = vmul.f32 %v1062_v22, %v842_v58  ;;  %v857_v16 = vsub.f32 %v849_v52, %v853_v60 }
 0x4ce   :  { %884 = vperm.xlu1 %1050, %v846_v59   ;;  %v854_v61 = vmul.f32 %v846_v59, %v1506_v57  ;;  %v852_v57 = vld [vmem:[%s1605_s6 + $0x18] sm:$0xff]  ;;  %s1003_s6 = sshll.u32 %s1139_s5, 4  ;;  %s1004_s6 = int_to_ptr.vmem [resolvable:$true] %s1003_s6 }
 0x4cf   :  { %v1064_v62 = vpop.eup %1063  ;;  %s1107_s21 = scalar_lea.vmem %s1004_s6, 2048  ;;  %p1112_p11 = scmp.lt.s32.totalorder %s1004_s6, %s1004_s6 }
 0x4d0   :  { %v858_v38 = vsub.f32 %v850_v24, %v854_v61  ;;  %v847_v0 = vmul.f32 %v1064_v62, %v843_v55  ;;  %p1108_p10 = scmp.ne.s32.totalorder %s1004_s6, %s1107_s21  ;;  %p1113_p12 = scmp.lt.s32.totalorder %s1107_s21, %s1107_s21 }
 0x4d2   :  { %931 = vperm.xlu1 %1050, %v857_v16   ;;  %936 = vperm.xlu0 %1049, %v858_v38   ;;  %v855_v44 = vmul.f32 %v847_v0, %v1516_v63  ;;  %p1114_p13 = por %p1113_p12, %p1112_p11 }
 0x4d3   :  { %v1066_v39 = vpop.eup %1065 }
 0x4d4   :  { %v848_v40 = vmul.f32 %v1066_v39, %v844_v53  ;;  %v859_v41 = vsub.f32 %v851_v32, %v855_v44  ;;  %p1115_p0 = pnand %p1114_p13, %p1108_p10 }
 0x4d6   :  { %889 = vperm.xlu1 %1050, %v847_v0   ;;  %894 = vperm.xlu0 %1049, %v848_v40   ;;  %v856_v25 = vmul.f32 %v848_v40, %v1526_v49 }
 0x4d8   :  { %v860_v20 = vsub.f32 %v852_v57, %v856_v25 }
 0x4da   :  { %941 = vperm.xlu1 %1050, %v859_v41   ;;  %946 = vperm.xlu0 %1049, %v860_v20  }
 0x545   :  { %v880_v27 = vpop.permute.xlu0 %879 }
 0x546   :  { %v897_v26 = vmul.f32 %v880_v27, %v1448_v18  ;;  %v898_v63 = vmul.f32 %v880_v27, %v1452_v28  ;;  %v899_v56 = vmul.f32 %v880_v27, %v1450_v19  ;;  %v900_v30 = vmul.f32 %v880_v27, %v1454_v29 }
 0x548   :  { %v913_v29 = vadd.f32 %v897_v26, %v1267_v14  ;;  %v914_v22 = vadd.f32 %v898_v63, %v1255_v12 }
 0x549   :  { %v885_v21 = vpop.permute.xlu1 %884 }
 0x54a   :  { %v901_v51 = vmul.f32 %v885_v21, %v1458_v33  ;;  %v902_v23 = vmul.f32 %v885_v21, %v1463_v42  ;;  %v903_v49 = vmul.f32 %v885_v21, %v1460_v34  ;;  %v904_v54 = vmul.f32 %v885_v21, %v1465_v35 }
 0x54b   :  { %v915_v33 = vadd.f32 %v1279_v17, %v899_v56  ;;  %v916_v42 = vadd.f32 %v1272_v15, %v900_v30 }
 0x54c   :  { %v917_v50 = vadd.f32 %v901_v51, %v1238_v9  ;;  %v918_v58 = vadd.f32 %v902_v23, %v1226_v7  ;;  %v919_v18 = vadd.f32 %v1260_v13, %v903_v49  ;;  %v920_v28 = vadd.f32 %v1248_v11, %v904_v54 }
 0x54d   :  { %v937_v19 = vpop.permute.xlu0 %936  ;;  %v932_v34 = vpop.permute.xlu1 %931 }
 0x54e   :  { %v953_v59 = vadd.f32 %v937_v19, %v917_v50  ;;  %v954_v35 = vadd.f32 %v937_v19, %v918_v58  ;;  %v955_v60 = vadd.f32 %v937_v19, %v919_v18  ;;  %v956_v9 = vadd.f32 %v937_v19, %v920_v28 }
 0x54f   :  { %v949_v52 = vadd.f32 %v932_v34, %v913_v29  ;;  %v950_v7 = vadd.f32 %v932_v34, %v914_v22  ;;  %v951_v24 = vadd.f32 %v932_v34, %v915_v33  ;;  %v952_v13 = vadd.f32 %v932_v34, %v916_v42 }
 0x550   :  { %v969_v55 = vmax.f32 %v953_v59, 0.0  ;;  %v970_v11 = vmax.f32 %v954_v35, 0.0  ;;  %v971_v61 = vmax.f32 %v955_v60, 0.0  ;;  %v972_v62 = vmax.f32 %v956_v9, 0.0 }
 0x551   :  { %v965_v14 = vmax.f32 %v949_v52, 0.0  ;;  %v966_v16 = vmax.f32 %v950_v7, 0.0  ;;  %v967_v12 = vmax.f32 %v951_v24, 0.0  ;;  %v968_v38 = vmax.f32 %v952_v13, 0.0  ;;  %v895_v17 = vpop.permute.xlu0 %894  ;;  %v890_v0 = vpop.permute.xlu1 %889 }
 0x552   :  { %983 = vst [vmem:[#allocation9 + $0x10] sm:$0xff] %v969_v55  ;;  %984 = vst [vmem:[#allocation9 + $0x18] sm:$0xff] %v970_v11  ;;  %v909_v15 = vmul.f32 %v895_v17, %v1482_v37  ;;  %v910_v53 = vmul.f32 %v895_v17, %v1485_v46  ;;  %v911_v39 = vmul.f32 %v895_v17, %v1487_v47 }
 0x553   :  { %992 = vst [vmem:[#allocation9 + $0x50] sm:$0xff] %v971_v61  ;;  %993 = vst [vmem:[#allocation9 + $0x58] sm:$0xff] %v972_v62  ;;  %v912_v40 = vmul.f32 %v895_v17, %v1493_v48  ;;  %v905_v44 = vmul.f32 %v890_v0, %v1470_v43  ;;  %v906_v32 = vmul.f32 %v890_v0, %v1475_v31 }
 0x554   :  { %981 = vst [vmem:[#allocation9] sm:$0xff] %v965_v14  ;;  %982 = vst [vmem:[#allocation9 + $0x8] sm:$0xff] %v966_v16  ;;  %v907_v57 = vmul.f32 %v890_v0, %v1472_v45  ;;  %v908_v25 = vmul.f32 %v890_v0, %v1477_v36  ;;  %v925_v37 = vadd.f32 %v909_v15, %v1198_v2 }
 0x555   :  { %990 = vst [vmem:[#allocation9 + $0x40] sm:$0xff] %v967_v12  ;;  %991 = vst [vmem:[#allocation9 + $0x48] sm:$0xff] %v968_v38  ;;  %v926_v46 = vadd.f32 %v910_v53, %v1193_v1  ;;  %v927_v47 = vadd.f32 %v1219_v6, %v911_v39  ;;  %v928_v48 = vadd.f32 %v1209_v4, %v912_v40  ;;  %v947_v41 = vpop.permute.xlu0 %946  ;;  %v942_v45 = vpop.permute.xlu1 %941 }
 0x556   :  { %v921_v20 = vadd.f32 %v905_v44, %v1214_v5  ;;  %v922_v27 = vadd.f32 %v906_v32, %v1203_v3  ;;  %v923_v43 = vadd.f32 %v1243_v10, %v907_v57  ;;  %v924_v31 = vadd.f32 %v1231_v8, %v908_v25 }
 0x557   :  { %v961_v36 = vadd.f32 %v947_v41, %v925_v37  ;;  %v962_v2 = vadd.f32 %v947_v41, %v926_v46  ;;  %v963_v26 = vadd.f32 %v947_v41, %v927_v47  ;;  %v964_v1 = vadd.f32 %v947_v41, %v928_v48 }
 0x558   :  { %v957_v63 = vadd.f32 %v942_v45, %v921_v20  ;;  %v958_v6 = vadd.f32 %v942_v45, %v922_v27  ;;  %v959_v56 = vadd.f32 %v942_v45, %v923_v43  ;;  %v960_v4 = vadd.f32 %v942_v45, %v924_v31 }
 0x559   :  { %v977_v30 = vmax.f32 %v961_v36, 0.0  ;;  %v978_v21 = vmax.f32 %v962_v2, 0.0  ;;  %v979_v5 = vmax.f32 %v963_v26, 0.0  ;;  %v980_v51 = vmax.f32 %v964_v1, 0.0 }
 0x55a   :  { %v973_v3 = vmax.f32 %v957_v63, 0.0  ;;  %v974_v10 = vmax.f32 %v958_v6, 0.0  ;;  %v975_v23 = vmax.f32 %v959_v56, 0.0  ;;  %v976_v8 = vmax.f32 %v960_v4, 0.0 }
 0x55b   :  { %987 = vst [vmem:[#allocation9 + $0x30] sm:$0xff] %v977_v30  ;;  %988 = vst [vmem:[#allocation9 + $0x38] sm:$0xff] %v978_v21 }
 0x55c   :  { %996 = vst [vmem:[#allocation9 + $0x70] sm:$0xff] %v979_v5  ;;  %997 = vst [vmem:[#allocation9 + $0x78] sm:$0xff] %v980_v51 }
 0x55d   :  { %985 = vst [vmem:[#allocation9 + $0x20] sm:$0xff] %v973_v3  ;;  %986 = vst [vmem:[#allocation9 + $0x28] sm:$0xff] %v974_v10 }
 0x55e   :  { %994 = vst [vmem:[#allocation9 + $0x60] sm:$0xff] %v975_v23  ;;  %995 = vst [vmem:[#allocation9 + $0x68] sm:$0xff] %v976_v8 }
 0x55f   :  { %1118 = shalt.err (!%p1115_p0)
}
 0x560   :  { %s1140_s22 = smov 256   ;;  %s1141_s23 = smov 16  }
 0x561   :  { %1009 = dma.vmem_to_hbm [thread:$0]  %s1004_s6, 2048, %s1606_s7, [#allocation6], %s1140_s22, %s1140_s22, %s1141_s23  }
 0x562   :  { %1131 = dma.done.wait [#allocation6], 2048  }
 0x563   :  { %1132 = vsyncadd [#allocation6], 4294965248 }
 0x564   :  { %1013 = vsyncpa [#allocation5], 1 }
 0x565   :  { %1014 = vsyncpa [#allocation8], 1 }
 0x566   :  { %1015 = vsyncpa [#allocation6], 1 }

</bundles_post_ra>
